<compile_context>
chip_gen: v6e
topology: v6e:2x2x1
jax: 0.10.0
libtpu: 0.0.40
codegen_flags: <defaults>
</compile_context>

<pallas_src>
import numpy as np
import jax
import jax.numpy as jnp
from jax.experimental import pallas as pl
from jax.experimental.pallas import tpu as pltpu

DARKNET_H = 128   # small stand-in for darknet_model.height (416 in the real cfg)
DARKNET_W = 128   # small stand-in for darknet_model.width
RENDER_SIZE = 64  # small stand-in for the neural-renderer image size


# ----------------------------------------------------------------------------
# Static resize / pad matrices (host-side numpy; tiny, built once per shape).
# ----------------------------------------------------------------------------
def _bilinear_matrix(out_size, in_size):
    """Matrix matching F.interpolate(..., mode='bilinear', align_corners=False,
    antialias=False) applied along one axis."""
    scale = in_size / out_size
    j = np.arange(out_size)
    src = np.clip((j + 0.5) * scale - 0.5, 0.0, None)
    i0 = np.minimum(np.floor(src).astype(np.int64), in_size - 1)
    frac = (src - i0).astype(np.float32)
    i1 = np.minimum(i0 + 1, in_size - 1)
    m = np.zeros((out_size, in_size), np.float32)
    m[j, i0] += 1.0 - frac
    m[j, i1] += frac
    return m


def _paste_matrices(i_h, i_w, r_h, r_w, out_h, out_w, h_top, w_top):
    """Fold flip + bilinear resize + zero pad into two static matrices so that

          pasted = Mh_pad @ img @ MwT_pad        (out_h x out_w)

    Mh_pad : (out_h, i_h), rows [h_top, h_top+r_h) hold the bilinear rows.
    MwT_pad: (i_w, out_w), cols [w_top, w_top+r_w) hold the (flipped) bilinear
             rows, pre-transposed so the kernel never transposes on the XLU.
    All other rows/cols are zero, so the pad region evaluates to exactly 0.0
    (matching F.pad(..., value=0.0)) and the where(==0, bk, .) keeps the exact
    torch semantics."""
    mh = _bilinear_matrix(r_h, i_h)            # (r_h, i_h)
    mw = _bilinear_matrix(r_w, i_w)            # (r_w, i_w)
    mw_flip = mw[:, ::-1]                      # fold torch.flip(image, [-1])
    mh_pad = np.zeros((out_h, i_h), np.float32)
    mh_pad[h_top:h_top + r_h, :] = mh
    mwT_pad = np.zeros((i_w, out_w), np.float32)
    mwT_pad[:, w_top:w_top + r_w] = mw_flip.T
    return jnp.asarray(mh_pad), jnp.asarray(mwT_pad)


# ----------------------------------------------------------------------------
# Fused flip -> bilinear resize -> pad -> where(==0, bk) kernel.
# ----------------------------------------------------------------------------
def fused_flip_resize_pad_where(rendered, bk_image, mh_pad, mwT_pad):
    """rendered: (1, C, H, W); bk_image: (B, C, OH, OW)  ->  (B, C, OH, OW)."""
    n, c, h, w = rendered.shape
    # The original cumulative-pad loop is only shape-consistent for batch == 1;
    # we intentionally do not generalize past that.
    assert n == 1, "paste() semantics are only shape-consistent for rendered batch == 1"
    b, c_bk, oh, ow = bk_image.shape
    assert c_bk == c
    img_planes = rendered.reshape(c, h, w)

    def kernel(mh_ref, mwT_ref, img_ref, bk_ref, out_ref):
        mh = mh_ref[...]            # (OH, H)
        mwT = mwT_ref[...]          # (W, OW), pre-transposed on host
        for ci in range(c):         # C is tiny and static (3)
            # flip + resize + pad all folded into the static matrices (MXU work)
            tmp = jnp.dot(mh, img_ref[ci], preferred_element_type=jnp.float32)   # (OH, W)
            pasted = jnp.dot(tmp, mwT, preferred_element_type=jnp.float32)       # (OH, OW)
            # torch.where(pasted == 0.0, bk, pasted); full 128-lane-dense store.
            out_ref[0, ci] = jnp.where(pasted == 0.0, bk_ref[0, ci], pasted)

    return pl.pallas_call(
        kernel,
        out_shape=jax.ShapeDtypeStruct((b, c, oh, ow), jnp.float32),
        grid=(b,),  # parallel over the background batch -> both TCs on v7x
        in_specs=[
            pl.BlockSpec((oh, h), lambda i: (0, 0)),              # Mh_pad (constant)
            pl.BlockSpec((w, ow), lambda i: (0, 0)),              # MwT_pad (constant)
            pl.BlockSpec((c, h, w), lambda i: (0, 0, 0)),         # rendered planes,
                                                                  # broadcast (no jnp.tile)
            pl.BlockSpec((1, c, oh, ow), lambda i: (i, 0, 0, 0)),  # bk[i]
        ],
        out_specs=pl.BlockSpec((1, c, oh, ow), lambda i: (i, 0, 0, 0)),
        compiler_params=pltpu.CompilerParams(
            dimension_semantics=("parallel",),
            vmem_limit_bytes=32 * 1024 * 1024,  # small blocks; safe on v5e/v6e/v7x
        ),
    )(mh_pad, mwT_pad, img_planes, bk_image)


def nearest_resize(x, out_h, out_w):
    """F.interpolate(x, (out_h, out_w)) with the default mode='nearest'.
    Only needed if the pasted size differs from the detector size; in this
    configuration it is the identity and is skipped by the caller."""
    _, _, h, w = x.shape
    hi = jnp.floor(jnp.arange(out_h) * (h / out_h)).astype(jnp.int32)
    wi = jnp.floor(jnp.arange(out_w) * (w / out_w)).astype(jnp.int32)
    return x[:, :, hi, :][:, :, :, wi]


# ----------------------------------------------------------------------------
# Model
# ----------------------------------------------------------------------------
class RenderModelPallas:
    def __init__(self, key):
        k1, k2, k3 = jax.random.split(key, 3)
        # nn.Parameter(torch.full((99964, 4, 4, 4, 3), 0.5))
        self.grad_textures = jnp.full((99964, 4, 4, 4, 3), 0.5, jnp.float32)
        # nn.Linear(3, 24), nn.Linear(12, 192): unused by forward(); kept for fidelity.
        self.linear1_w = 0.02 * jax.random.normal(k1, (24, 3), jnp.float32)
        self.linear1_b = jnp.zeros((24,), jnp.float32)
        self.linear2_w = 0.02 * jax.random.normal(k2, (192, 12), jnp.float32)
        self.linear2_b = jnp.zeros((192,), jnp.float32)
        # nn.ConvTranspose3d(3, 3, (3,3,3)): unused by forward(); kept for fidelity.
        self.convtranspose_w = 0.02 * jax.random.normal(k3, (3, 3, 3, 3, 3), jnp.float32)
        self.convtranspose_b = jnp.zeros((3,), jnp.float32)
        # stand-ins for self.darknet_model.height / .width
        self.height = DARKNET_H
        self.width = DARKNET_W
        # TODO(synk): Darknet(cfgfile) + load_weights(weightfile) is an external
        # pretrained detector; not translatable here.
        # TODO(synk): nr.Renderer (differentiable rasterizer) has no Pallas equivalent.

    def paste(self, img, bk_image):
        """Fused Pallas version of RenderModel.paste (plus the preceding flip)."""
        n, c, i_h, i_w = img.shape
        scale = 0.75
        r_h, r_w = int(scale * i_h), int(scale * i_w)
        h_pad_len = self.height - r_h
        w_pad_len = self.height - r_w   # NOTE: original uses `height` for the width pad too
        h_top = int(h_pad_len * 0.75)
        w_top = int(w_pad_len * 0.5)
        out_h = r_h + h_pad_len          # == self.height
        out_w = r_w + w_pad_len          # == self.height
        mh_pad, mwT_pad = _paste_matrices(i_h, i_w, r_h, r_w, out_h, out_w, h_top, w_top)
        return fused_flip_resize_pad_where(img, bk_image, mh_pad, mwT_pad)

    def forward(self, rendered_image, bk_image, angle):
        del angle  # only consumed by the (untranslatable) renderer's eye position
        _textures = self.grad_textures[None]  # .unsqueeze(0); consumed only by the renderer
        # TODO(synk): image, _, _ = self.renderer(vertices, faces, textures) -- the
        # rasterizer is not translatable; `rendered_image` stands in for its output.
        # torch.flip(image, [-1]) is folded into the fused paste kernel.
        training_images = self.paste(rendered_image, bk_image)
        # F.interpolate(..., (height, width), mode='nearest'): identity here because
        # the pasted output is already (height, height) == (height, width).
        if training_images.shape[2:] != (self.height, self.width):
            training_images = nearest_resize(training_images, self.height, self.width)
        p_img_batch = training_images
        # TODO(synk): PIL ToPILImage + img.save('data/result.jpg') is host I/O; omitted.
        # TODO(synk): output = self.darknet_model(p_img_batch) -- frozen pretrained
        # Darknet detector; returning its prepared input tensor instead.
        return p_img_batch


if __name__ == "__main__":
    key = jax.random.PRNGKey(0)
    k_model, k_img, k_bk = jax.random.split(key, 3)
    model = RenderModelPallas(k_model)

    # Synthetic stand-in for the renderer output: (1, 3, 64, 64) with a zero
    # background border so the paste/where path is exercised.
    img = jax.random.uniform(k_img, (1, 3, RENDER_SIZE, RENDER_SIZE), jnp.float32,
                             minval=0.1, maxval=1.0)
    yy = jnp.arange(RENDER_SIZE)
    inside = (yy >= 16) & (yy < 48)
    mask = (inside[:, None] & inside[None, :]).astype(jnp.float32)
    img = img * mask[None, None]

    bk_image = jax.random.uniform(k_bk, (2, 3, DARKNET_H, DARKNET_W), jnp.float32,
                                  minval=0.1, maxval=1.0)

    out = model.forward(img, bk_image, angle=0.0)
    out = jax.block_until_ready(out)
    assert out.shape == (2, 3, DARKNET_H, DARKNET_W), out.shape
    assert bool(jnp.isfinite(out).all())

    # ----- lightweight correctness checks vs. the unfused reference ---------
    scale = 0.75
    r = int(scale * RENDER_SIZE)
    h_pad = DARKNET_H - r
    w_pad = DARKNET_H - r
    h_top, w_top = int(h_pad * 0.75), int(w_pad * 0.5)

    np_out = np.asarray(out)
    np_bk = np.asarray(bk_image)
    # Pad region is exactly zero in the pasted image -> must equal bk exactly.
    assert np.array_equal(np_out[:, :, :h_top, :], np_bk[:, :, :h_top, :])
    assert np.array_equal(np_out[:, :, h_top + r:, :], np_bk[:, :, h_top + r:, :])
    assert np.array_equal(np_out[:, :, :, :w_top], np_bk[:, :, :, :w_top])
    assert np.array_equal(np_out[:, :, :, w_top + r:], np_bk[:, :, :, w_top + r:])

    # Full numpy reference: flip -> bilinear resize -> pad -> where(==0, bk, .)
    mh = _bilinear_matrix(r, RENDER_SIZE)
    mw = _bilinear_matrix(r, RENDER_SIZE)
    flipped = np.asarray(img)[..., ::-1]
    resized = np.einsum('oh,nchw,pw->ncop', mh, flipped, mw)
    padded = np.zeros((1, 3, DARKNET_H, DARKNET_H), np.float32)
    padded[:, :, h_top:h_top + r, w_top:w_top + r] = resized
    ref = np.where(padded == 0.0, np_bk, padded)
    assert np.allclose(np_out, ref, rtol=0.0, atol=2e-2), float(np.abs(np_out - ref).max())

    print("KERNEL_OK")
</pallas_src>

<mosaic_0001>
module attributes {stable_mosaic.version = 11 : i64} {
  func.func @kernel(%arg0: i32, %arg1: memref<128x64xf32, #tpu.memory_space<vmem>>, %arg2: memref<64x128xf32, #tpu.memory_space<vmem>>, %arg3: memref<3x64x64xf32, #tpu.memory_space<vmem>>, %arg4: memref<1x3x128x128xf32, #tpu.memory_space<vmem>>, %arg5: memref<1x3x128x128xf32, #tpu.memory_space<vmem>>) attributes {dimension_semantics = [#tpu.dimension_semantics<parallel>], iteration_bounds = array<i64: 2>, scalar_prefetch = 0 : i64, scratch_operands = 0 : i64, tpu.core_type = #tpu.core_type<tc>, window_params = [{pipeline_mode = #tpu.pipeline_mode<synchronous>, transform_indices = @transform_0, window_bounds = array<i64: 128, 64>}, {pipeline_mode = #tpu.pipeline_mode<synchronous>, transform_indices = @transform_1, window_bounds = array<i64: 64, 128>}, {pipeline_mode = #tpu.pipeline_mode<synchronous>, transform_indices = @transform_2, window_bounds = array<i64: 3, 64, 64>}, {transform_indices = @transform_3, window_bounds = array<i64: 1, 3, 128, 128>}, {transform_indices = @transform_4, window_bounds = array<i64: 1, 3, 128, 128>}]} {
    %c0 = arith.constant 0 : index
    %c0_0 = arith.constant 0 : index
    %0 = vector.load %arg1[%c0, %c0_0] : memref<128x64xf32, #tpu.memory_space<vmem>>, vector<128x64xf32>
    %c0_1 = arith.constant 0 : index
    %c0_2 = arith.constant 0 : index
    %1 = vector.load %arg2[%c0_1, %c0_2] : memref<64x128xf32, #tpu.memory_space<vmem>>, vector<64x128xf32>
    %c0_3 = arith.constant 0 : index
    %c0_4 = arith.constant 0 : index
    %c0_5 = arith.constant 0 : index
    %2 = vector.load %arg3[%c0_3, %c0_4, %c0_5] : memref<3x64x64xf32, #tpu.memory_space<vmem>>, vector<1x64x64xf32>
    %3 = vector.shape_cast %2 : vector<1x64x64xf32> to vector<64x64xf32>
    %cst = arith.constant dense<0.000000e+00> : vector<128x64xf32>
    %4 = tpu.matmul %0, %3, %cst {dimension_numbers = #tpu.dot_dimension_numbers<[1], [0], [0], [1], [0, 0, 1, 1], [], []>} : vector<128x64xf32>, vector<64x64xf32>, vector<128x64xf32> -> vector<128x64xf32>
    %cst_6 = arith.constant dense<0.000000e+00> : vector<128x128xf32>
    %5 = tpu.matmul %4, %1, %cst_6 {dimension_numbers = #tpu.dot_dimension_numbers<[1], [0], [0], [1], [0, 0, 1, 1], [], []>} : vector<128x64xf32>, vector<64x128xf32>, vector<128x128xf32> -> vector<128x128xf32>
    %cst_7 = arith.constant 0.000000e+00 : f32
    %6 = vector.broadcast %cst_7 : f32 to vector<128x128xf32>
    %7 = arith.cmpf oeq, %5, %6 : vector<128x128xf32>
    %c0_8 = arith.constant 0 : index
    %c0_9 = arith.constant 0 : index
    %c0_10 = arith.constant 0 : index
    %c0_11 = arith.constant 0 : index
    %8 = vector.load %arg4[%c0_8, %c0_9, %c0_10, %c0_11] : memref<1x3x128x128xf32, #tpu.memory_space<vmem>>, vector<1x1x128x128xf32>
    %9 = vector.shape_cast %8 : vector<1x1x128x128xf32> to vector<128x128xf32>
    %10 = arith.select %7, %9, %5 : vector<128x128xi1>, vector<128x128xf32>
    %c0_12 = arith.constant 0 : index
    %c0_13 = arith.constant 0 : index
    %c0_14 = arith.constant 0 : index
    %c0_15 = arith.constant 0 : index
    %11 = vector.load %arg5[%c0_12, %c0_13, %c0_14, %c0_15] : memref<1x3x128x128xf32, #tpu.memory_space<vmem>>, vector<1x1x128x128xf32>
    %12 = vector.shape_cast %11 : vector<1x1x128x128xf32> to vector<128x128xf32>
    %13 = vector.shape_cast %10 : vector<128x128xf32> to vector<1x1x128x128xf32>
    tpu.vector_store %arg5[%c0_12, %c0_13, %c0_14, %c0_15], %13 {strides = array<i32>} : memref<1x3x128x128xf32, #tpu.memory_space<vmem>>, vector<1x1x128x128xf32>,
    %c1 = arith.constant 1 : index
    %c0_16 = arith.constant 0 : index
    %c0_17 = arith.constant 0 : index
    %14 = vector.load %arg3[%c1, %c0_16, %c0_17] : memref<3x64x64xf32, #tpu.memory_space<vmem>>, vector<1x64x64xf32>
    %15 = vector.shape_cast %14 : vector<1x64x64xf32> to vector<64x64xf32>
    %cst_18 = arith.constant dense<0.000000e+00> : vector<128x64xf32>
    %16 = tpu.matmul %0, %15, %cst_18 {dimension_numbers = #tpu.dot_dimension_numbers<[1], [0], [0], [1], [0, 0, 1, 1], [], []>} : vector<128x64xf32>, vector<64x64xf32>, vector<128x64xf32> -> vector<128x64xf32>
    %cst_19 = arith.constant dense<0.000000e+00> : vector<128x128xf32>
    %17 = tpu.matmul %16, %1, %cst_19 {dimension_numbers = #tpu.dot_dimension_numbers<[1], [0], [0], [1], [0, 0, 1, 1], [], []>} : vector<128x64xf32>, vector<64x128xf32>, vector<128x128xf32> -> vector<128x128xf32>
    %cst_20 = arith.constant 0.000000e+00 : f32
    %18 = vector.broadcast %cst_20 : f32 to vector<128x128xf32>
    %19 = arith.cmpf oeq, %17, %18 : vector<128x128xf32>
    %c0_21 = arith.constant 0 : index
    %c1_22 = arith.constant 1 : index
    %c0_23 = arith.constant 0 : index
    %c0_24 = arith.constant 0 : index
    %20 = vector.load %arg4[%c0_21, %c1_22, %c0_23, %c0_24] : memref<1x3x128x128xf32, #tpu.memory_space<vmem>>, vector<1x1x128x128xf32>
    %21 = vector.shape_cast %20 : vector<1x1x128x128xf32> to vector<128x128xf32>
    %22 = arith.select %19, %21, %17 : vector<128x128xi1>, vector<128x128xf32>
    %c0_25 = arith.constant 0 : index
    %c1_26 = arith.constant 1 : index
    %c0_27 = arith.constant 0 : index
    %c0_28 = arith.constant 0 : index
    %23 = vector.load %arg5[%c0_25, %c1_26, %c0_27, %c0_28] : memref<1x3x128x128xf32, #tpu.memory_space<vmem>>, vector<1x1x128x128xf32>
    %24 = vector.shape_cast %23 : vector<1x1x128x128xf32> to vector<128x128xf32>
    %25 = vector.shape_cast %22 : vector<128x128xf32> to vector<1x1x128x128xf32>
    tpu.vector_store %arg5[%c0_25, %c1_26, %c0_27, %c0_28], %25 {strides = array<i32>} : memref<1x3x128x128xf32, #tpu.memory_space<vmem>>, vector<1x1x128x128xf32>,
    %c2 = arith.constant 2 : index
    %c0_29 = arith.constant 0 : index
    %c0_30 = arith.constant 0 : index
    %26 = vector.load %arg3[%c2, %c0_29, %c0_30] : memref<3x64x64xf32, #tpu.memory_space<vmem>>, vector<1x64x64xf32>
    %27 = vector.shape_cast %26 : vector<1x64x64xf32> to vector<64x64xf32>
    %cst_31 = arith.constant dense<0.000000e+00> : vector<128x64xf32>
    %28 = tpu.matmul %0, %27, %cst_31 {dimension_numbers = #tpu.dot_dimension_numbers<[1], [0], [0], [1], [0, 0, 1, 1], [], []>} : vector<128x64xf32>, vector<64x64xf32>, vector<128x64xf32> -> vector<128x64xf32>
    %cst_32 = arith.constant dense<0.000000e+00> : vector<128x128xf32>
    %29 = tpu.matmul %28, %1, %cst_32 {dimension_numbers = #tpu.dot_dimension_numbers<[1], [0], [0], [1], [0, 0, 1, 1], [], []>} : vector<128x64xf32>, vector<64x128xf32>, vector<128x128xf32> -> vector<128x128xf32>
    %cst_33 = arith.constant 0.000000e+00 : f32
    %30 = vector.broadcast %cst_33 : f32 to vector<128x128xf32>
    %31 = arith.cmpf oeq, %29, %30 : vector<128x128xf32>
    %c0_34 = arith.constant 0 : index
    %c2_35 = arith.constant 2 : index
    %c0_36 = arith.constant 0 : index
    %c0_37 = arith.constant 0 : index
    %32 = vector.load %arg4[%c0_34, %c2_35, %c0_36, %c0_37] : memref<1x3x128x128xf32, #tpu.memory_space<vmem>>, vector<1x1x128x128xf32>
    %33 = vector.shape_cast %32 : vector<1x1x128x128xf32> to vector<128x128xf32>
    %34 = arith.select %31, %33, %29 : vector<128x128xi1>, vector<128x128xf32>
    %c0_38 = arith.constant 0 : index
    %c2_39 = arith.constant 2 : index
    %c0_40 = arith.constant 0 : index
    %c0_41 = arith.constant 0 : index
    %35 = vector.load %arg5[%c0_38, %c2_39, %c0_40, %c0_41] : memref<1x3x128x128xf32, #tpu.memory_space<vmem>>, vector<1x1x128x128xf32>
    %36 = vector.shape_cast %35 : vector<1x1x128x128xf32> to vector<128x128xf32>
    %37 = vector.shape_cast %34 : vector<128x128xf32> to vector<1x1x128x128xf32>
    tpu.vector_store %arg5[%c0_38, %c2_39, %c0_40, %c0_41], %37 {strides = array<i32>} : memref<1x3x128x128xf32, #tpu.memory_space<vmem>>, vector<1x1x128x128xf32>,
    return
  }
  func.func @transform_0(%arg0: i32) -> (i32, i32) {
    %c0_i32 = arith.constant 0 : i32
    %c0_i32_0 = arith.constant 0 : i32
    %c0_i32_1 = arith.constant 0 : i32
    return %c0_i32, %c0_i32_0 : i32, i32
  }
  func.func @transform_1(%arg0: i32) -> (i32, i32) {
    %c0_i32 = arith.constant 0 : i32
    %c0_i32_0 = arith.constant 0 : i32
    %c0_i32_1 = arith.constant 0 : i32
    return %c0_i32, %c0_i32_0 : i32, i32
  }
  func.func @transform_2(%arg0: i32) -> (i32, i32, i32) {
    %c0_i32 = arith.constant 0 : i32
    %c0_i32_0 = arith.constant 0 : i32
    %c0_i32_1 = arith.constant 0 : i32
    %c0_i32_2 = arith.constant 0 : i32
    return %c0_i32, %c0_i32_0, %c0_i32_1 : i32, i32, i32
  }
  func.func @transform_3(%arg0: i32) -> (i32, i32, i32, i32) {
    %c0_i32 = arith.constant 0 : i32
    %c0_i32_0 = arith.constant 0 : i32
    %c0_i32_1 = arith.constant 0 : i32
    %c0_i32_2 = arith.constant 0 : i32
    return %arg0, %c0_i32, %c0_i32_0, %c0_i32_1 : i32, i32, i32, i32
  }
  func.func @transform_4(%arg0: i32) -> (i32, i32, i32, i32) {
    %c0_i32 = arith.constant 0 : i32
    %c0_i32_0 = arith.constant 0 : i32
    %c0_i32_1 = arith.constant 0 : i32
    %c0_i32_2 = arith.constant 0 : i32
    return %arg0, %c0_i32, %c0_i32_0, %c0_i32_1 : i32, i32, i32, i32
  }
}

</mosaic_0001>

<bundles_post_ra>
// kernel: tpu_custom_call.1
= control target key start
LH: loop header
LB: loop body
LE: loop exit
PB: predicated region body
PF: predicated region fallthrough
CT: control target
= control target key end

     0   :  { %9 = vsyncpa [#allocation3], 0  ;;  %s3073_s0 = inlined_call_operand.vmem [shape: f32[128,64], index: 0, kind: input, shape index: {}]   ;;  %s3074_s1 = inlined_call_operand.hbm [shape: f32[64,128], index: 1, kind: input, shape index: {}]   ;;  %s3075_s2 = inlined_call_operand.vmem [shape: f32[3,64,64], index: 2, kind: input, shape index: {}]   ;;  %s3076_s3 = inlined_call_operand.hbm [shape: f32[2,3,128,128], index: 3, kind: input, shape index: {}]   ;;  %s3077_s4 = inlined_call_operand.hbm [shape: f32[2,3,128,128], index: 4, kind: output, shape index: {}]  }
   0x1   :  { %10 = vsyncpa [#allocation6], 0 }
   0x2   :  { %12 = vsyncpa [#allocation6 + $0x1], 0 }
   0x3   :  { %13 = vsyncpa [#allocation4], 0 }
   0x4   :  { %15 = vsyncpa [#allocation4 + $0x1], 0  ;;  %s2430_s15 = smov 0   ;;  %s2432_s16 = smov 0  }
   0x5   :  { %s2434_s17 = smov 0   ;;  %s2436_s18 = smov 0  }
   0x6 LB: > { %s2451_s19 = sadd.s32 4294967295, %s2396_s18   ;;  %s1639_s20 = sadd.s32 4294967294, %s2396_s18   ;;  %s2396_s18 = sphi %s2436_s18, %s3099_s18   ;;  %s2392_s17 = sphi %s2434_s17, %s3098_s17   ;;  %s2388_s16 = sphi %s2432_s16, %s3097_s16   ;;  %s2384_s15 = sphi %s2430_s15, %s3096_s15  }
   0x7   : > { %p104_p0 = scmp.ne.s32.totalorder %s2388_s16, %s2384_s15  ;;  %p3078_p1 = scmp.eq.s32.totalorder %s2451_s19, 0 }
   0x8   : > { %p134_p3 = scmp.eq.s32.totalorder %s1639_s20, 1  ;;  %p1640_p5 = scmp.ge.s32.totalorder %s2396_s18, 1 }
   0x9   : > { %p2460_p4 = por %p3078_p1, %p104_p0  ;;  %p141_p7 = scmp.lt.s32.totalorder %s2396_s18, 3 }
   0xa   : > { %p2465_p6 = por %p134_p3, %p104_p0  ;;  %s2398_s24 = smov [#allocation2]  }
   0xb   : > { %s3082_s21 = scalar_select %p2460_p4, 1, 0 }
   0xc   : > { %s3083_s22 = scalar_select %p2465_p6, 1, 0 }
   0xd   : > { %p2470_p8 = pnand %p1640_p5, %p141_p7  ;;  %s156_s25 = sshll.u32 %s2398_s24, 4  ;;  %s157_s25 = int_to_ptr.vmem [resolvable:$true] %s156_s25 }
   0xe   : > { %s2484_s27 = sadd.s32 1, %s2396_s18   ;;  %s91_s28 = sadd.s32 1, %s2392_s17 }
   0xf   : > { %s3084_s23 = scalar_select %p2470_p8, 1, 0 }
  0x10   : > { %p2221_p9 = pneg %p2470_p8  ;;  %s88_s29 = ssub.s32 %s2396_s18, %s2484_s27 }
  0x11   : > { %s2285_s30 = scalar_lea.vmem %s157_s25, 1024  ;;  %p2293_p5 = scmp.lt.s32.totalorder %s157_s25, %s157_s25 }
  0x12   : > { %p2479_p11 = pnand %p2221_p9, %p3078_p1  ;;  %p2286_p13 = scmp.ne.s32.totalorder %s157_s25, %s2285_s30 }
  0x13   : > { %p2294_p7 = scmp.lt.s32.totalorder %s2285_s30, %s2285_s30 }
  0x14   : > { %p2276_p12 = pneg %p2479_p11 }
  0x15   : > { %p2295_p10 = por %p2294_p7, %p2293_p5 }
  0x16   : > { %p2288_p0 = pnand %p2286_p13, %p2276_p12 }
  0x18   : > { %p2289_p3 = pneg %p2288_p0 }
  0x1a   : > { %p2296_p2 = pnand %p2295_p10, %p2289_p3 }
  0x1c   : > { %2299 = shalt.err (!%p2296_p2)
}
  0x1d   : > { %s2399_s5 = smov 128   ;;  %s2400_s6 = smov 8  }
  0x1e   : > { %2224 = dma.hbm_to_vmem [thread:$0]  (!%p2479_p11), %s3074_s1, 1024, %s157_s25, [#allocation3], %s2399_s5, %s2399_s5, %s2400_s6  }
  0x1f   : > { %p89_p2 = scmp.eq.s32.totalorder %s88_s29, 0  ;;  %p98_p9 = scmp.ne.s32.totalorder %s2392_s17, %s2388_s16 }
  0x20   : > { %p99_p10 = scmp.eq.s32.totalorder %s2396_s18, 0  ;;  %p2234_p12 = scmp.lt.s32.totalorder %s2396_s18, 2 }
  0x21   : > { %s2504_s9 = scalar_select %p89_p2, %s2392_s17, %s91_s28  }
  0x22   : > { %p100_p13 = por %p99_p10, %p98_p9  ;;  %p3086_p0 = scmp.eq.s32.totalorder %s2451_s19, 1 }
  0x23   : > { %s173_s11 = sand.u32 1, %s2392_s17   ;;  %s2210_s12 = smul.u32 6144, %s2396_s18 }
  0x24   : > { %p2508_p3 = por %p3086_p0, %p98_p9  ;;  %s2209_s13 = smul.u32 384, %s173_s11 }
  0x25   : > { %p2514_p5 = pnand %p2234_p12, %p100_p13  ;;  %s2521_s25 = scalar_lea.hbm %s3076_s3, %s2210_s12 }
  0x26   : > { %s3087_s10 = scalar_select %p2508_p3, 1, 0 }
  0x27   : > { %s177_s26 = scalar_lea.vmem [#allocation5], %s2209_s13  ;;  %s2525_s29 = scalar_lea.sflag [#allocation6], %s173_s11 }
  0x28   : > { %s184_s28 = sshll.u32 %s177_s26, 4  ;;  %s2300_s30 = scalar_lea.hbm %s2521_s25, 6144  ;;  %s2523_s28 = int_to_ptr.vmem [resolvable:$true] %s184_s28 }
  0x29   : > { %p2301_p11 = scmp.ne.s32.totalorder %s2521_s25, %s2300_s30  ;;  %p2302_p7 = pneg %p2514_p5 }
  0x2a   : > { %s2305_s12 = scalar_lea.hbm %s3076_s3, 12288  ;;  %p2306_p10 = scmp.lt.s32.totalorder %s2521_s25, %s3076_s3 }
  0x2b   : > { %p2303_p2 = pnand %p2302_p7, %p2301_p11  ;;  %p2307_p12 = scmp.lt.s32.totalorder %s2305_s12, %s2300_s30 }
  0x2d   : > { %p2304_p9 = pneg %p2303_p2  ;;  %p2308_p13 = por %p2307_p12, %p2306_p10 }
  0x2f   : > { %p2309_p0 = pnand %p2308_p13, %p2304_p9 }
  0x31   : > { %2312 = shalt.err (!%p2309_p0)
}
  0x32   : > { %s2313_s11 = scalar_lea.vmem %s2523_s28, 6144  ;;  %s2401_s13 = smov [#allocation5]  }
  0x33   : > { %p2314_p1 = scmp.ne.s32.totalorder %s2523_s28, %s2313_s11  ;;  %s2318_s26 = sshll.u32 %s2401_s13, 4  ;;  %s2319_s26 = int_to_ptr.vmem [resolvable:$false] %s2318_s26 }
  0x34   : > { %s2320_s7 = scalar_lea.vmem %s2319_s26, 12288  ;;  %p2321_p2 = scmp.lt.s32.totalorder %s2523_s28, %s2319_s26 }
  0x35   : > { %p2316_p6 = pnand %p2314_p1, %p2302_p7  ;;  %p2322_p3 = scmp.lt.s32.totalorder %s2320_s7, %s2313_s11 }
  0x37   : > { %p2317_p11 = pneg %p2316_p6  ;;  %p2323_p4 = por %p2322_p3, %p2321_p2 }
  0x39   : > { %p2324_p8 = pnand %p2323_p4, %p2317_p11 }
  0x3b   : > { %2327 = shalt.err (!%p2324_p8)
}
  0x3c   : > { %2228 = dma.hbm_to_vmem [thread:$0]  (!%p2514_p5), %s2521_s25, 6144, %s2523_s28, %s2525_s29, %s2399_s5, %s2399_s5, %s2400_s6  }
  0x3d   : > { %p3089_p1 = scmp.ne.s32.totalorder %s3084_s23, 0 }
  0x3e   : > { %p3090_p6 = scmp.eq.s32.totalorder (!%p3089_p1), %s2451_s19, 0 }
  0x3f   : > { %196 = sbr.rel (%p3089_p1) target bundleno = 590 (0x24e), region = 36 }
  0x44   : > { %2371 = dma.done.wait (%p3090_p6), [#allocation3], 1024   ;;  %p3091_p7 = pmov %p3090_p6 }
  0x45   : > { %s2556_s30 = sand.u32 1, %s2388_s16   ;;  %p3092_p4 = scmp.ne.s32.totalorder %s3082_s21, 0 }
  0x46   : > { %2373 = vsyncadd (%p3091_p7), [#allocation3], 4294966272  ;;  %s2211_s14 = smul.u32 384, %s2556_s30  ;;  %s203_s8 = scalar_lea.sflag [#allocation6], %s2556_s30 }
  0x48   : > { %s2562_s5 = scalar_lea.vmem [#allocation5], %s2211_s14 }
  0x49   : > { %2375 = dma.done.wait (%p3092_p4), %s203_s8, 6144  }
  0x4a   : > { %2377 = vsyncadd (%p3092_p4), %s203_s8, 4294961152  ;;  %v262_v0 = vld [vmem:[%s3075_s2 + $0x38] sm:$0xff]  ;;  %v261_v1 = vld [vmem:[%s3075_s2 + $0x30] sm:$0xff]  ;;  %vm263_vm0 = vcmask 523264   ;;  %s2927_s13 = scalar_lea.vmem [#allocation7], %s2211_s14  ;;  %s2212_s14 = smul.u32 6144, %s2451_s19 }
  0x4b   : > { %1969 = vmatprep.subr.mxu0 %v262_v0  ;;  %v260_v2 = vld [vmem:[%s3075_s2 + $0x28] sm:$0xff]  ;;  %v2580_v3 = vld [vmem:[%s3073_s0] sm:$0xff]  ;;  %v258_v5 = vld [vmem:[%s3075_s2 + $0x18] sm:$0xff]  ;;  %s1554_s26 = sshll.u32 %s2927_s13, 4  ;;  %s1541_s19 = scalar_lea.sflag [#allocation4], %s2556_s30  ;;  %s3028_s26 = int_to_ptr.vmem [resolvable:$true] %s1554_s26 }
  0x4c   : > { %1970 = vmatpush3.msra.mxu0 %v262_v0  ;;  %1985 = vmatprep.mubr.msk.f32.mxu0 %vm263_vm0, %v2580_v3  ;;  %v259_v4 = vld [vmem:[%s3075_s2 + $0x20] sm:$0xff]  ;;  %v257_v6 = vld [vmem:[%s3075_s2 + $0x10] sm:$0xff]  ;;  %v256_v7 = vld [vmem:[%s3075_s2 + $0x8] sm:$0xff]  ;;  %s3026_s23 = scalar_lea.hbm %s3077_s4, %s2212_s14  ;;  %s2328_s6 = scalar_lea.vmem %s3028_s26, 6144 }
  0x4d   : > { %1971 = vmatprep.subr.mxu0 %v261_v1  ;;  %v255_v8 = vld [vmem:[%s3075_s2] sm:$0xff]  ;;  %v2599_v9 = vld [vmem:[#allocation2 + $0x38] sm:$0xff]  ;;  %v2601_v10 = vld [vmem:[#allocation2 + $0x30] sm:$0xff]  ;;  %p2329_p8 = scmp.ne.s32.totalorder %s3028_s26, %s2328_s6  ;;  %p3093_p3 = scmp.ne.s32.totalorder %s3087_s10, 0 }
  0x4e   : > { %1972 = vmatpush3.msra.mxu0 %v261_v1  ;;  %v2606_v11 = vld [vmem:[%s3073_s0 + $0x8] sm:$0xff]  ;;  %v1685_v12 = vld [vmem:[%s3075_s2 + $0x78] sm:$0xff]  ;;  %2009 = vmatprep.subr.mxu1 %v2599_v9  ;;  %v2615_v13 = vld [vmem:[%s3073_s0 + $0x10] sm:$0xff] }
  0x4f   : > { %1973 = vmatprep.subr.mxu0 %v260_v2  ;;  %2010 = vmatpush3.msra.mxu1 %v2599_v9  ;;  %v1684_v14 = vld [vmem:[%s3075_s2 + $0x70] sm:$0xff]  ;;  %v2624_v15 = vld [vmem:[#allocation2 + $0x28] sm:$0xff]  ;;  %v2631_v16 = vld [vmem:[%s3073_s0 + $0x18] sm:$0xff]  ;;  %p2330_p5 = pnand %p2329_p8, %p3093_p3 }
  0x50   : > { %1974 = vmatpush3.msra.mxu0 %v260_v2  ;;  %2011 = vmatprep.subr.mxu1 %v2601_v10  ;;  %v1683_v17 = vld [vmem:[%s3075_s2 + $0x68] sm:$0xff]  ;;  %v2639_v18 = vld [vmem:[%s3073_s0 + $0x20] sm:$0xff]  ;;  %v1681_v22 = vld [vmem:[%s3075_s2 + $0x58] sm:$0xff] }
  0x51   : > { %1975 = vmatprep.subr.mxu0 %v259_v4  ;;  %2012 = vmatpush3.msra.mxu1 %v2601_v10  ;;  %v1682_v19 = vld [vmem:[%s3075_s2 + $0x60] sm:$0xff]  ;;  %v2655_v21 = vld [vmem:[%s3073_s0 + $0x28] sm:$0xff]  ;;  %v2663_v23 = vld [vmem:[%s3073_s0 + $0x30] sm:$0xff]  ;;  %p2331_p9 = pneg %p2330_p5 }
  0x52   : > { %1976 = vmatpush3.msra.mxu0 %v259_v4  ;;  %2013 = vmatprep.subr.mxu1 %v2624_v15  ;;  %v2648_v20 = vld [vmem:[#allocation2 + $0x20] sm:$0xff]  ;;  %v1680_v24 = vld [vmem:[%s3075_s2 + $0x50] sm:$0xff]  ;;  %v2672_v25 = vld [vmem:[#allocation2 + $0x18] sm:$0xff] }
  0x53   : > { %1977 = vmatprep.subr.mxu0 %v258_v5  ;;  %2014 = vmatpush3.msra.mxu1 %v2624_v15  ;;  %v2679_v26 = vld [vmem:[%s3073_s0 + $0x38] sm:$0xff]  ;;  %v1679_v27 = vld [vmem:[%s3075_s2 + $0x48] sm:$0xff]  ;;  %v2687_v28 = vld [vmem:[%s3073_s0 + $0x40] sm:$0xff] }
  0x54   : > { %1978 = vmatpush3.msra.mxu0 %v258_v5  ;;  %2015 = vmatprep.subr.mxu1 %v2648_v20  ;;  %v1678_v29 = vld [vmem:[%s3075_s2 + $0x40] sm:$0xff]  ;;  %v2696_v30 = vld [vmem:[#allocation2 + $0x10] sm:$0xff]  ;;  %v2703_v31 = vld [vmem:[%s3073_s0 + $0x48] sm:$0xff] }
  0x55   : > { %1979 = vmatprep.subr.mxu0 %v257_v6  ;;  %2016 = vmatpush3.msra.mxu1 %v2648_v20  ;;  %v1757_v32 = vld [vmem:[%s3075_s2 + $0xb8] sm:$0xff]  ;;  %v2711_v33 = vld [vmem:[%s3073_s0 + $0x50] sm:$0xff]  ;;  %v2728_v35 = vld [vmem:[%s3073_s0 + $0x60] sm:$0xff] }
  0x56   : > { %1980 = vmatpush3.msra.mxu0 %v257_v6  ;;  %2017 = vmatprep.subr.mxu1 %v2672_v25  ;;  %v2722_v34 = vld [vmem:[%s3073_s0 + $0x58] sm:$0xff]  ;;  %v2737_v36 = vld [vmem:[%s3073_s0 + $0x68] sm:$0xff]  ;;  %v2742_v37 = vld [vmem:[%s3073_s0 + $0x70] sm:$0xff] }
  0x57   : > { %1981 = vmatprep.subr.mxu0 %v256_v7  ;;  %2018 = vmatpush3.msra.mxu1 %v2672_v25  ;;  %v246_v38 = vld [vmem:[%s3073_s0 + $0x78] sm:$0xff]  ;;  %v1756_v39 = vld [vmem:[%s3075_s2 + $0xb0] sm:$0xff]  ;;  %v1755_v40 = vld [vmem:[%s3075_s2 + $0xa8] sm:$0xff] }
  0x58   : > { %1982 = vmatpush3.msra.mxu0 %v256_v7  ;;  %2019 = vmatprep.subr.mxu1 %v2696_v30  ;;  %v1754_v41 = vld [vmem:[%s3075_s2 + $0xa0] sm:$0xff]  ;;  %v1753_v42 = vld [vmem:[%s3075_s2 + $0x98] sm:$0xff]  ;;  %v1752_v43 = vld [vmem:[%s3075_s2 + $0x90] sm:$0xff] }
  0x59   : > { %1983 = vmatprep.subr.mxu0 %v255_v8  ;;  %2020 = vmatpush3.msra.mxu1 %v2696_v30  ;;  %v1751_v44 = vld [vmem:[%s3075_s2 + $0x88] sm:$0xff]  ;;  %v1750_v45 = vld [vmem:[%s3075_s2 + $0x80] sm:$0xff] }
  0x5a   : > { %1984 = vmatpush3.msra.mxu0 %v255_v8  ;;  %v2806_v46 = vld [vmem:[#allocation2 + $0x8] sm:$0xff]  ;;  %v2814_v47 = vld [vmem:[#allocation2] sm:$0xff] }
  0x5b   : > { %1986 = vmatmul.mubr.msk.f32.vlgmr.msra.gmra.mxu0 %vm263_vm0, %v2606_v11  ;;  %2049 = vmatprep.subr.mxu0 %v1685_v12 }
  0x5c   : > { %2050 = vmatpush3.msra.mxu0 %v1685_v12  ;;  %1988 = vmatprep.mubr.msk.f32.mxu0 %vm263_vm0, %v2615_v13 }
  0x5d   : > { %2051 = vmatprep.subr.mxu0 %v1684_v14  ;;  %2021 = vmatprep.subr.mxu1 %v2806_v46 }
  0x5e   : > { %2052 = vmatpush3.msra.mxu0 %v1684_v14  ;;  %2022 = vmatpush3.msra.mxu1 %v2806_v46 }
  0x5f   : > { %1989 = vmatmul.mubr.msk.f32.gmra.mxu0 %vm263_vm0, %v2631_v16  ;;  %2053 = vmatprep.subr.mxu0 %v1683_v17 }
  0x60   : > { %1991 = vmatprep.mubr.msk.f32.mxu0 %vm263_vm0, %v2639_v18  ;;  %2054 = vmatpush3.msra.mxu0 %v1683_v17 }
  0x61   : > { %2055 = vmatprep.subr.mxu0 %v1682_v19  ;;  %2023 = vmatprep.subr.mxu1 %v2814_v47 }
  0x62   : > { %2056 = vmatpush3.msra.mxu0 %v1682_v19  ;;  %2024 = vmatpush3.msra.mxu1 %v2814_v47 }
  0x63   : > { %1992 = vmatmul.mubr.msk.f32.gmra.mxu0 %vm263_vm0, %v2655_v21  ;;  %2057 = vmatprep.subr.mxu0 %v1681_v22 }
  0x64   : > { %1994 = vmatprep.mubr.msk.f32.mxu0 %vm263_vm0, %v2663_v23  ;;  %2058 = vmatpush3.msra.mxu0 %v1681_v22 }
  0x65   : > { %2059 = vmatprep.subr.mxu0 %v1680_v24  ;;  %2089 = vmatprep.subr.mxu1 %v2599_v9 }
  0x66   : > { %2060 = vmatpush3.msra.mxu0 %v1680_v24 }
  0x67   : > { %1995 = vmatmul.mubr.msk.f32.gmra.mxu0 %vm263_vm0, %v2679_v26  ;;  %2061 = vmatprep.subr.mxu0 %v1679_v27 }
  0x68   : > { %1997 = vmatprep.mubr.msk.f32.mxu0 %vm263_vm0, %v2687_v28  ;;  %2062 = vmatpush3.msra.mxu0 %v1679_v27 }
  0x69   : > { %2063 = vmatprep.subr.mxu0 %v1678_v29 }
  0x6a   : > { %2064 = vmatpush3.msra.mxu0 %v1678_v29 }
  0x6b   : > { %1998 = vmatmul.mubr.msk.f32.gmra.mxu0 %vm263_vm0, %v2703_v31  ;;  %2129 = vmatprep.subr.mxu0 %v1757_v32 }
  0x6c   : > { %2000 = vmatprep.mubr.msk.f32.mxu0 %vm263_vm0, %v2711_v33 }
  0x6f   : > { %2001 = vmatmul.mubr.msk.f32.gmra.mxu0 %vm263_vm0, %v2722_v34 }
  0x70   : > { %2003 = vmatprep.mubr.msk.f32.mxu0 %vm263_vm0, %v2728_v35 }
  0x73   : > { %2004 = vmatmul.mubr.msk.f32.gmra.mxu0 %vm263_vm0, %v2737_v36 }
  0x74   : > { %2006 = vmatprep.mubr.msk.f32.mxu0 %vm263_vm0, %v2742_v37 }
  0x77   : > { %2007 = vmatmul.mubr.msk.f32.gmra.mxu0 %vm263_vm0, %v246_v38 }
  0x78   : > { %2065 = vmatprep.mubr.msk.f32.mxu0 %vm263_vm0, %v2580_v3 }
  0x7b   : > { %2066 = vmatmul.mubr.msk.f32.vlgmr.msra.gmra.mxu0 %vm263_vm0, %v2606_v11 }
  0x7c   : > { %2130 = vmatpush3.msra.mxu0 %v1757_v32  ;;  %2068 = vmatprep.mubr.msk.f32.mxu0 %vm263_vm0, %v2615_v13  ;;  %v667_v32 = vld [vmem:[%s2562_s5 + $0x8] sm:$0xff] }
  0x7d   : > { %2131 = vmatprep.subr.mxu0 %v1756_v39 }
  0x7e   : > { %2132 = vmatpush3.msra.mxu0 %v1756_v39 }
  0x7f   : > { %2069 = vmatmul.mubr.msk.f32.gmra.mxu0 %vm263_vm0, %v2631_v16  ;;  %2133 = vmatprep.subr.mxu0 %v1755_v40 }
  0x80   : > { %2071 = vmatprep.mubr.msk.f32.mxu0 %vm263_vm0, %v2639_v18  ;;  %2134 = vmatpush3.msra.mxu0 %v1755_v40  ;;  %v668_v40 = vld [vmem:[%s2562_s5 + $0x10] sm:$0xff] }
  0x81   : > { %2135 = vmatprep.subr.mxu0 %v1754_v41 }
  0x82   : > { %2136 = vmatpush3.msra.mxu0 %v1754_v41 }
  0x83   : > { %2072 = vmatmul.mubr.msk.f32.gmra.mxu0 %vm263_vm0, %v2655_v21  ;;  %2137 = vmatprep.subr.mxu0 %v1753_v42 }
  0x84   : > { %2074 = vmatprep.mubr.msk.f32.mxu0 %vm263_vm0, %v2663_v23  ;;  %2138 = vmatpush3.msra.mxu0 %v1753_v42 }
  0x85   : > { %2139 = vmatprep.subr.mxu0 %v1752_v43 }
  0x86   : > { %2140 = vmatpush3.msra.mxu0 %v1752_v43  ;;  %v671_v43 = vld [vmem:[%s2562_s5 + $0x28] sm:$0xff] }
  0x87   : > { %2075 = vmatmul.mubr.msk.f32.gmra.mxu0 %vm263_vm0, %v2679_v26  ;;  %2141 = vmatprep.subr.mxu0 %v1751_v44 }
  0x88   : > { %2077 = vmatprep.mubr.msk.f32.mxu0 %vm263_vm0, %v2687_v28  ;;  %2142 = vmatpush3.msra.mxu0 %v1751_v44 }
  0x89   : > { %2143 = vmatprep.subr.mxu0 %v1750_v45 }
  0x8a   : > { %2144 = vmatpush3.msra.mxu0 %v1750_v45 }
  0x8b   : > { %2078 = vmatmul.mubr.msk.f32.gmra.mxu0 %vm263_vm0, %v2703_v31 }
  0x8c   : > { %2080 = vmatprep.mubr.msk.f32.mxu0 %vm263_vm0, %v2711_v33 }
  0x8f   : > { %2081 = vmatmul.mubr.msk.f32.gmra.mxu0 %vm263_vm0, %v2722_v34 }
  0x90   : > { %2083 = vmatprep.mubr.msk.f32.mxu0 %vm263_vm0, %v2728_v35 }
  0x93   : > { %2084 = vmatmul.mubr.msk.f32.gmra.mxu0 %vm263_vm0, %v2737_v36 }
  0x94   : > { %2086 = vmatprep.mubr.msk.f32.mxu0 %vm263_vm0, %v2742_v37 }
  0x97   : > { %2087 = vmatmul.mubr.msk.f32.gmra.mxu0 %vm263_vm0, %v246_v38 }
  0x98   : > { %2145 = vmatprep.mubr.msk.f32.mxu0 %vm263_vm0, %v2580_v3 }
  0x9b   : > { %2146 = vmatmul.mubr.msk.f32.vlgmr.msra.gmra.mxu0 %vm263_vm0, %v2606_v11 }
  0x9c   : > { %2148 = vmatprep.mubr.msk.f32.mxu0 %vm263_vm0, %v2615_v13 }
  0x9f   : > { %2149 = vmatmul.mubr.msk.f32.gmra.mxu0 %vm263_vm0, %v2631_v16 }
  0xa0   : > { %2151 = vmatprep.mubr.msk.f32.mxu0 %vm263_vm0, %v2639_v18 }
  0xa3   : > { %2152 = vmatmul.mubr.msk.f32.gmra.mxu0 %vm263_vm0, %v2655_v21 }
  0xa4   : > { %2154 = vmatprep.mubr.msk.f32.mxu0 %vm263_vm0, %v2663_v23 }
  0xa7   : > { %2155 = vmatmul.mubr.msk.f32.gmra.mxu0 %vm263_vm0, %v2679_v26 }
  0xa8   : > { %2157 = vmatprep.mubr.msk.f32.mxu0 %vm263_vm0, %v2687_v28 }
  0xab   : > { %2158 = vmatmul.mubr.msk.f32.gmra.mxu0 %vm263_vm0, %v2703_v31 }
  0xac   : > { %2160 = vmatprep.mubr.msk.f32.mxu0 %vm263_vm0, %v2711_v33 }
  0xaf   : > { %2161 = vmatmul.mubr.msk.f32.gmra.mxu0 %vm263_vm0, %v2722_v34  ;;  %v666_v34 = vld [vmem:[%s2562_s5] sm:$0xff] }
  0xb0   : > { %2163 = vmatprep.mubr.msk.f32.mxu0 %vm263_vm0, %v2728_v35 }
  0xb3   : > { %2164 = vmatmul.mubr.msk.f32.gmra.mxu0 %vm263_vm0, %v2737_v36 }
  0xb4   : > { %2166 = vmatprep.mubr.msk.f32.mxu0 %vm263_vm0, %v2742_v37  ;;  %v669_v37 = vld [vmem:[%s2562_s5 + $0x18] sm:$0xff] }
  0xb7   : > { %2167 = vmatmul.mubr.msk.f32.gmra.mxu0 %vm263_vm0, %v246_v38 }
 0x11b   : > { %v1987_v48 = vpop.f32.mrf.mxu0 }
 0x11d   : > { %v378_v49 = vpop.f32.mrf.mxu0 }
 0x11e   : > { %2025 = vmatprep.mubr.msk.f32.mxu1 %vm263_vm0, %v378_v49  ;;  %v673_v49 = vld [vmem:[%s2562_s5 + $0x38] sm:$0xff] }
 0x11f   : > { %v1990_v50 = vpop.f32.mrf.mxu0  ;;  %2026 = vmatmul.mubr.msk.f32.vlgmr.msra.gmra.mxu1 %vm263_vm0, %v1987_v48 }
 0x120   : > { %2090 = vmatpush3.msra.mxu1 %v2599_v9 }
 0x121   : > { %v388_v51 = vpop.f32.mrf.mxu0  ;;  %2091 = vmatprep.subr.mxu1 %v2601_v10 }
 0x122   : > { %2028 = vmatprep.mubr.msk.f32.mxu1 %vm263_vm0, %v388_v51  ;;  %2092 = vmatpush3.msra.mxu1 %v2601_v10 }
 0x123   : > { %v1993_v52 = vpop.f32.mrf.mxu0  ;;  %2029 = vmatmul.mubr.msk.f32.gmra.mxu1 %vm263_vm0, %v1990_v50  ;;  %2093 = vmatprep.subr.mxu1 %v2624_v15 }
 0x124   : > { %2094 = vmatpush3.msra.mxu1 %v2624_v15 }
 0x125   : > { %v398_v53 = vpop.f32.mrf.mxu0  ;;  %2095 = vmatprep.subr.mxu1 %v2648_v20 }
 0x126   : > { %2031 = vmatprep.mubr.msk.f32.mxu1 %vm263_vm0, %v398_v53  ;;  %2096 = vmatpush3.msra.mxu1 %v2648_v20 }
 0x127   : > { %v1996_v54 = vpop.f32.mrf.mxu0  ;;  %2032 = vmatmul.mubr.msk.f32.gmra.mxu1 %vm263_vm0, %v1993_v52  ;;  %2097 = vmatprep.subr.mxu1 %v2672_v25  ;;  %v672_v52 = vld [vmem:[%s2562_s5 + $0x30] sm:$0xff] }
 0x128   : > { %2098 = vmatpush3.msra.mxu1 %v2672_v25 }
 0x129   : > { %v408_v55 = vpop.f32.mrf.mxu0  ;;  %2099 = vmatprep.subr.mxu1 %v2696_v30 }
 0x12a   : > { %2034 = vmatprep.mubr.msk.f32.mxu1 %vm263_vm0, %v408_v55  ;;  %2100 = vmatpush3.msra.mxu1 %v2696_v30  ;;  %v675_v55 = vld [vmem:[%s2562_s5 + $0x48] sm:$0xff] }
 0x12b   : > { %v1999_v56 = vpop.f32.mrf.mxu0  ;;  %2035 = vmatmul.mubr.msk.f32.gmra.mxu1 %vm263_vm0, %v1996_v54  ;;  %2101 = vmatprep.subr.mxu1 %v2806_v46 }
 0x12c   : > { %2102 = vmatpush3.msra.mxu1 %v2806_v46 }
 0x12d   : > { %v418_v57 = vpop.f32.mrf.mxu0  ;;  %2103 = vmatprep.subr.mxu1 %v2814_v47 }
 0x12e   : > { %2037 = vmatprep.mubr.msk.f32.mxu1 %vm263_vm0, %v418_v57  ;;  %2104 = vmatpush3.msra.mxu1 %v2814_v47 }
 0x12f   : > { %v2002_v58 = vpop.f32.mrf.mxu0  ;;  %2038 = vmatmul.mubr.msk.f32.gmra.mxu1 %vm263_vm0, %v1999_v56  ;;  %2169 = vmatprep.subr.mxu1 %v2599_v9 }
 0x131   : > { %v428_v59 = vpop.f32.mrf.mxu0 }
 0x132   : > { %2040 = vmatprep.mubr.msk.f32.mxu1 %vm263_vm0, %v428_v59 }
 0x133   : > { %v2005_v60 = vpop.f32.mrf.mxu0  ;;  %2041 = vmatmul.mubr.msk.f32.gmra.mxu1 %vm263_vm0, %v2002_v58  ;;  %v674_v58 = vld [vmem:[%s2562_s5 + $0x40] sm:$0xff] }
 0x135   : > { %v438_v61 = vpop.f32.mrf.mxu0 }
 0x136   : > { %2043 = vmatprep.mubr.msk.f32.mxu1 %vm263_vm0, %v438_v61  ;;  %v677_v61 = vld [vmem:[%s2562_s5 + $0x58] sm:$0xff] }
 0x137   : > { %v2008_v62 = vpop.f32.mrf.mxu0  ;;  %2044 = vmatmul.mubr.msk.f32.gmra.mxu1 %vm263_vm0, %v2005_v60 }
 0x139   : > { %v448_v63 = vpop.f32.mrf.mxu0 }
 0x13a   : > { %2046 = vmatprep.mubr.msk.f32.mxu1 %vm263_vm0, %v448_v63 }
 0x13b   : > { %2047 = vmatmul.mubr.msk.f32.gmra.mxu1 %vm263_vm0, %v2008_v62  ;;  %v2067_v0 = vpop.f32.mrf.mxu0 }
 0x13d   : > { %v789_v1 = vpop.f32.mrf.mxu0 }
 0x13e   : > { %2105 = vmatprep.mubr.msk.f32.mxu1 %vm263_vm0, %v789_v1 }
 0x13f   : > { %v2070_v2 = vpop.f32.mrf.mxu0  ;;  %2106 = vmatmul.mubr.msk.f32.vlgmr.msra.gmra.mxu1 %vm263_vm0, %v2067_v0  ;;  %v676_v0 = vld [vmem:[%s2562_s5 + $0x50] sm:$0xff] }
 0x140   : > { %2170 = vmatpush3.msra.mxu1 %v2599_v9 }
 0x141   : > { %v799_v3 = vpop.f32.mrf.mxu0  ;;  %2171 = vmatprep.subr.mxu1 %v2601_v10 }
 0x142   : > { %2108 = vmatprep.mubr.msk.f32.mxu1 %vm263_vm0, %v799_v3  ;;  %2172 = vmatpush3.msra.mxu1 %v2601_v10  ;;  %v679_v3 = vld [vmem:[%s2562_s5 + $0x68] sm:$0xff] }
 0x143   : > { %v2073_v4 = vpop.f32.mrf.mxu0  ;;  %2109 = vmatmul.mubr.msk.f32.gmra.mxu1 %vm263_vm0, %v2070_v2  ;;  %2173 = vmatprep.subr.mxu1 %v2624_v15 }
 0x144   : > { %2174 = vmatpush3.msra.mxu1 %v2624_v15 }
 0x145   : > { %v809_v5 = vpop.f32.mrf.mxu0  ;;  %2175 = vmatprep.subr.mxu1 %v2648_v20 }
 0x146   : > { %2111 = vmatprep.mubr.msk.f32.mxu1 %vm263_vm0, %v809_v5  ;;  %2176 = vmatpush3.msra.mxu1 %v2648_v20 }
 0x147   : > { %v2076_v6 = vpop.f32.mrf.mxu0  ;;  %2112 = vmatmul.mubr.msk.f32.gmra.mxu1 %vm263_vm0, %v2073_v4  ;;  %2177 = vmatprep.subr.mxu1 %v2672_v25 }
 0x148   : > { %2178 = vmatpush3.msra.mxu1 %v2672_v25 }
 0x149   : > { %v819_v7 = vpop.f32.mrf.mxu0  ;;  %2179 = vmatprep.subr.mxu1 %v2696_v30 }
 0x14a   : > { %2114 = vmatprep.mubr.msk.f32.mxu1 %vm263_vm0, %v819_v7  ;;  %2180 = vmatpush3.msra.mxu1 %v2696_v30 }
 0x14b   : > { %v2079_v8 = vpop.f32.mrf.mxu0  ;;  %2115 = vmatmul.mubr.msk.f32.gmra.mxu1 %vm263_vm0, %v2076_v6  ;;  %2181 = vmatprep.subr.mxu1 %v2806_v46  ;;  %v678_v6 = vld [vmem:[%s2562_s5 + $0x60] sm:$0xff] }
 0x14c   : > { %2182 = vmatpush3.msra.mxu1 %v2806_v46  ;;  %v670_v46 = vld [vmem:[%s2562_s5 + $0x20] sm:$0xff] }
 0x14d   : > { %v829_v9 = vpop.f32.mrf.mxu0  ;;  %2183 = vmatprep.subr.mxu1 %v2814_v47 }
 0x14e   : > { %2117 = vmatprep.mubr.msk.f32.mxu1 %vm263_vm0, %v829_v9  ;;  %2184 = vmatpush3.msra.mxu1 %v2814_v47  ;;  %v681_v9 = vld [vmem:[%s2562_s5 + $0x78] sm:$0xff] }
 0x14f   : > { %v2082_v10 = vpop.f32.mrf.mxu0  ;;  %2118 = vmatmul.mubr.msk.f32.gmra.mxu1 %vm263_vm0, %v2079_v8 }
 0x151   : > { %v839_v11 = vpop.f32.mrf.mxu0 }
 0x152   : > { %2120 = vmatprep.mubr.msk.f32.mxu1 %vm263_vm0, %v839_v11 }
 0x153   : > { %v2085_v12 = vpop.f32.mrf.mxu0  ;;  %2121 = vmatmul.mubr.msk.f32.gmra.mxu1 %vm263_vm0, %v2082_v10 }
 0x155   : > { %v849_v13 = vpop.f32.mrf.mxu0 }
 0x156   : > { %2123 = vmatprep.mubr.msk.f32.mxu1 %vm263_vm0, %v849_v13 }
 0x157   : > { %v2088_v14 = vpop.f32.mrf.mxu0  ;;  %2124 = vmatmul.mubr.msk.f32.gmra.mxu1 %vm263_vm0, %v2085_v12  ;;  %v680_v12 = vld [vmem:[%s2562_s5 + $0x70] sm:$0xff] }
 0x159   : > { %v859_v15 = vpop.f32.mrf.mxu0 }
 0x15a   : > { %2126 = vmatprep.mubr.msk.f32.mxu1 %vm263_vm0, %v859_v15  ;;  %v1719_v15 = vld [vmem:[%s2562_s5 + $0x88] sm:$0xff] }
 0x15b   : > { %2127 = vmatmul.mubr.msk.f32.gmra.mxu1 %vm263_vm0, %v2088_v14  ;;  %v2147_v16 = vpop.f32.mrf.mxu0 }
 0x15d   : > { %v1202_v17 = vpop.f32.mrf.mxu0 }
 0x15e   : > { %2185 = vmatprep.mubr.msk.f32.mxu1 %vm263_vm0, %v1202_v17 }
 0x15f   : > { %v2150_v18 = vpop.f32.mrf.mxu0  ;;  %2186 = vmatmul.mubr.msk.f32.vlgmr.msra.gmra.mxu1 %vm263_vm0, %v2147_v16 }
 0x161   : > { %v1212_v19 = vpop.f32.mrf.mxu0 }
 0x162   : > { %2188 = vmatprep.mubr.msk.f32.mxu1 %vm263_vm0, %v1212_v19 }
 0x163   : > { %v2153_v20 = vpop.f32.mrf.mxu0  ;;  %2189 = vmatmul.mubr.msk.f32.gmra.mxu1 %vm263_vm0, %v2150_v18  ;;  %v1718_v18 = vld [vmem:[%s2562_s5 + $0x80] sm:$0xff] }
 0x165   : > { %v1222_v21 = vpop.f32.mrf.mxu0 }
 0x166   : > { %2191 = vmatprep.mubr.msk.f32.mxu1 %vm263_vm0, %v1222_v21  ;;  %v1721_v21 = vld [vmem:[%s2562_s5 + $0x98] sm:$0xff] }
 0x167   : > { %v2156_v22 = vpop.f32.mrf.mxu0  ;;  %2192 = vmatmul.mubr.msk.f32.gmra.mxu1 %vm263_vm0, %v2153_v20 }
 0x169   : > { %v1232_v23 = vpop.f32.mrf.mxu0 }
 0x16a   : > { %2194 = vmatprep.mubr.msk.f32.mxu1 %vm263_vm0, %v1232_v23 }
 0x16b   : > { %v2159_v24 = vpop.f32.mrf.mxu0  ;;  %2195 = vmatmul.mubr.msk.f32.gmra.mxu1 %vm263_vm0, %v2156_v22 }
 0x16d   : > { %v1242_v25 = vpop.f32.mrf.mxu0 }
 0x16e   : > { %2197 = vmatprep.mubr.msk.f32.mxu1 %vm263_vm0, %v1242_v25 }
 0x16f   : > { %v2162_v26 = vpop.f32.mrf.mxu0  ;;  %2198 = vmatmul.mubr.msk.f32.gmra.mxu1 %vm263_vm0, %v2159_v24  ;;  %v1720_v24 = vld [vmem:[%s2562_s5 + $0x90] sm:$0xff] }
 0x171   : > { %v1252_v27 = vpop.f32.mrf.mxu0 }
 0x172   : > { %2200 = vmatprep.mubr.msk.f32.mxu1 %vm263_vm0, %v1252_v27  ;;  %v1723_v27 = vld [vmem:[%s2562_s5 + $0xa8] sm:$0xff] }
 0x173   : > { %v2165_v28 = vpop.f32.mrf.mxu0  ;;  %2201 = vmatmul.mubr.msk.f32.gmra.mxu1 %vm263_vm0, %v2162_v26 }
 0x175   : > { %v1262_v29 = vpop.f32.mrf.mxu0 }
 0x176   : > { %2203 = vmatprep.mubr.msk.f32.mxu1 %vm263_vm0, %v1262_v29 }
 0x177   : > { %v2168_v30 = vpop.f32.mrf.mxu0  ;;  %2204 = vmatmul.mubr.msk.f32.gmra.mxu1 %vm263_vm0, %v2165_v28 }
 0x179   : > { %v1272_v31 = vpop.f32.mrf.mxu0 }
 0x17a   : > { %2206 = vmatprep.mubr.msk.f32.mxu1 %vm263_vm0, %v1272_v31 }
 0x17b   : > { %2207 = vmatmul.mubr.msk.f32.gmra.mxu1 %vm263_vm0, %v2168_v30  ;;  %v1722_v30 = vld [vmem:[%s2562_s5 + $0xa0] sm:$0xff] }
 0x1df   : > { %v2027_v33 = vpop.f32.mrf.mxu1 }
 0x1e0   : > { %vm651_vm1 = vcmp.eq.f32.partialorder %v2027_v33, 0.0 }
 0x1e1   : > { %v683_v35 = vsel %vm651_vm1, %v667_v32, %v2027_v33  ;;  %v571_v36 = vpop.f32.mrf.mxu1  ;;  %v1725_v33 = vld [vmem:[%s2562_s5 + $0xb8] sm:$0xff] }
 0x1e2   : > { %699 = vst [vmem:[%s2927_s13 + $0x8] sm:$0xff] %v683_v35  ;;  %vm650_vm2 = vcmp.eq.f32.partialorder %v571_v36, 0.0 }
 0x1e3   : > { %v682_v38 = vsel %vm650_vm2, %v666_v34, %v571_v36  ;;  %v2030_v39 = vpop.f32.mrf.mxu1  ;;  %v1724_v36 = vld [vmem:[%s2562_s5 + $0xb0] sm:$0xff] }
 0x1e4   : > { %698 = vst [vmem:[%s2927_s13] sm:$0xff] %v682_v38  ;;  %vm653_vm3 = vcmp.eq.f32.partialorder %v2030_v39, 0.0 }
 0x1e5   : > { %v685_v41 = vsel %vm653_vm3, %v669_v37, %v2030_v39  ;;  %v581_v42 = vpop.f32.mrf.mxu1  ;;  %v1727_v39 = vld [vmem:[%s2562_s5 + $0xc8] sm:$0xff] }
 0x1e6   : > { %701 = vst [vmem:[%s2927_s13 + $0x18] sm:$0xff] %v685_v41  ;;  %vm652_vm4 = vcmp.eq.f32.partialorder %v581_v42, 0.0 }
 0x1e7   : > { %v684_v44 = vsel %vm652_vm4, %v668_v40, %v581_v42  ;;  %v2033_v45 = vpop.f32.mrf.mxu1  ;;  %v1726_v42 = vld [vmem:[%s2562_s5 + $0xc0] sm:$0xff] }
 0x1e8   : > { %700 = vst [vmem:[%s2927_s13 + $0x10] sm:$0xff] %v684_v44  ;;  %vm655_vm5 = vcmp.eq.f32.partialorder %v2033_v45, 0.0 }
 0x1e9   : > { %v687_v47 = vsel %vm655_vm5, %v671_v43, %v2033_v45  ;;  %v591_v48 = vpop.f32.mrf.mxu1  ;;  %v1729_v45 = vld [vmem:[%s2562_s5 + $0xd8] sm:$0xff] }
 0x1ea   : > { %703 = vst [vmem:[%s2927_s13 + $0x28] sm:$0xff] %v687_v47  ;;  %vm654_vm6 = vcmp.eq.f32.partialorder %v591_v48, 0.0 }
 0x1eb   : > { %v686_v50 = vsel %vm654_vm6, %v670_v46, %v591_v48  ;;  %v2036_v51 = vpop.f32.mrf.mxu1  ;;  %v1728_v48 = vld [vmem:[%s2562_s5 + $0xd0] sm:$0xff] }
 0x1ec   : > { %702 = vst [vmem:[%s2927_s13 + $0x20] sm:$0xff] %v686_v50  ;;  %vm657_vm7 = vcmp.eq.f32.partialorder %v2036_v51, 0.0 }
 0x1ed   : > { %v689_v53 = vsel %vm657_vm7, %v673_v49, %v2036_v51  ;;  %v601_v54 = vpop.f32.mrf.mxu1  ;;  %v1731_v51 = vld [vmem:[%s2562_s5 + $0xe8] sm:$0xff] }
 0x1ee   : > { %705 = vst [vmem:[%s2927_s13 + $0x38] sm:$0xff] %v689_v53  ;;  %vm656_vm8 = vcmp.eq.f32.partialorder %v601_v54, 0.0 }
 0x1ef   : > { %v688_v56 = vsel %vm656_vm8, %v672_v52, %v601_v54  ;;  %v2039_v57 = vpop.f32.mrf.mxu1  ;;  %v1730_v54 = vld [vmem:[%s2562_s5 + $0xe0] sm:$0xff] }
 0x1f0   : > { %704 = vst [vmem:[%s2927_s13 + $0x30] sm:$0xff] %v688_v56  ;;  %vm659_vm9 = vcmp.eq.f32.partialorder %v2039_v57, 0.0 }
 0x1f1   : > { %v691_v59 = vsel %vm659_vm9, %v675_v55, %v2039_v57  ;;  %v611_v60 = vpop.f32.mrf.mxu1  ;;  %v1733_v57 = vld [vmem:[%s2562_s5 + $0xf8] sm:$0xff] }
 0x1f2   : > { %707 = vst [vmem:[%s2927_s13 + $0x48] sm:$0xff] %v691_v59  ;;  %vm658_vm10 = vcmp.eq.f32.partialorder %v611_v60, 0.0 }
 0x1f3   : > { %v690_v62 = vsel %vm658_vm10, %v674_v58, %v611_v60  ;;  %v2042_v63 = vpop.f32.mrf.mxu1  ;;  %v1732_v60 = vld [vmem:[%s2562_s5 + $0xf0] sm:$0xff] }
 0x1f4   : > { %706 = vst [vmem:[%s2927_s13 + $0x40] sm:$0xff] %v690_v62  ;;  %vm661_vm11 = vcmp.eq.f32.partialorder %v2042_v63, 0.0 }
 0x1f5   : > { %v693_v1 = vsel %vm661_vm11, %v677_v61, %v2042_v63  ;;  %v621_v2 = vpop.f32.mrf.mxu1  ;;  %v1791_v63 = vld [vmem:[%s2562_s5 + $0x108] sm:$0xff] }
 0x1f6   : > { %709 = vst [vmem:[%s2927_s13 + $0x58] sm:$0xff] %v693_v1  ;;  %vm660_vm12 = vcmp.eq.f32.partialorder %v621_v2, 0.0 }
 0x1f7   : > { %v692_v4 = vsel %vm660_vm12, %v676_v0, %v621_v2  ;;  %v2045_v5 = vpop.f32.mrf.mxu1  ;;  %v1790_v2 = vld [vmem:[%s2562_s5 + $0x100] sm:$0xff] }
 0x1f8   : > { %708 = vst [vmem:[%s2927_s13 + $0x50] sm:$0xff] %v692_v4  ;;  %vm663_vm13 = vcmp.eq.f32.partialorder %v2045_v5, 0.0 }
 0x1f9   : > { %v695_v7 = vsel %vm663_vm13, %v679_v3, %v2045_v5  ;;  %v631_v8 = vpop.f32.mrf.mxu1  ;;  %v1793_v5 = vld [vmem:[%s2562_s5 + $0x118] sm:$0xff] }
 0x1fa   : > { %711 = vst [vmem:[%s2927_s13 + $0x68] sm:$0xff] %v695_v7  ;;  %vm662_vm14 = vcmp.eq.f32.partialorder %v631_v8, 0.0 }
 0x1fb   : > { %v694_v10 = vsel %vm662_vm14, %v678_v6, %v631_v8  ;;  %v2048_v11 = vpop.f32.mrf.mxu1  ;;  %v1792_v8 = vld [vmem:[%s2562_s5 + $0x110] sm:$0xff] }
 0x1fc   : > { %710 = vst [vmem:[%s2927_s13 + $0x60] sm:$0xff] %v694_v10  ;;  %vm665_vm15 = vcmp.eq.f32.partialorder %v2048_v11, 0.0 }
 0x1fd   : > { %v697_v13 = vsel %vm665_vm15, %v681_v9, %v2048_v11  ;;  %v641_v14 = vpop.f32.mrf.mxu1  ;;  %v1795_v11 = vld [vmem:[%s2562_s5 + $0x128] sm:$0xff] }
 0x1fe   : > { %713 = vst [vmem:[%s2927_s13 + $0x78] sm:$0xff] %v697_v13  ;;  %vm664_vm0 = vcmp.eq.f32.partialorder %v641_v14, 0.0 }
 0x1ff   : > { %v696_v16 = vsel %vm664_vm0, %v680_v12, %v641_v14  ;;  %v2107_v17 = vpop.f32.mrf.mxu1  ;;  %v1794_v14 = vld [vmem:[%s2562_s5 + $0x120] sm:$0xff] }
 0x200   : > { %712 = vst [vmem:[%s2927_s13 + $0x70] sm:$0xff] %v696_v16  ;;  %vm1062_vm1 = vcmp.eq.f32.partialorder %v2107_v17, 0.0 }
 0x201   : > { %v1095_v19 = vsel %vm1062_vm1, %v1719_v15, %v2107_v17  ;;  %v982_v20 = vpop.f32.mrf.mxu1  ;;  %v1797_v17 = vld [vmem:[%s2562_s5 + $0x138] sm:$0xff] }
 0x202   : > { %1735 = vst [vmem:[%s2927_s13 + $0x88] sm:$0xff] %v1095_v19  ;;  %vm1061_vm2 = vcmp.eq.f32.partialorder %v982_v20, 0.0 }
 0x203   : > { %v1094_v22 = vsel %vm1061_vm2, %v1718_v18, %v982_v20  ;;  %v2110_v23 = vpop.f32.mrf.mxu1  ;;  %v1796_v20 = vld [vmem:[%s2562_s5 + $0x130] sm:$0xff] }
 0x204   : > { %1734 = vst [vmem:[%s2927_s13 + $0x80] sm:$0xff] %v1094_v22  ;;  %vm1064_vm3 = vcmp.eq.f32.partialorder %v2110_v23, 0.0 }
 0x205   : > { %v1097_v25 = vsel %vm1064_vm3, %v1721_v21, %v2110_v23  ;;  %v992_v26 = vpop.f32.mrf.mxu1  ;;  %v1799_v23 = vld [vmem:[%s2562_s5 + $0x148] sm:$0xff] }
 0x206   : > { %1737 = vst [vmem:[%s2927_s13 + $0x98] sm:$0xff] %v1097_v25  ;;  %vm1063_vm4 = vcmp.eq.f32.partialorder %v992_v26, 0.0 }
 0x207   : > { %v1096_v28 = vsel %vm1063_vm4, %v1720_v24, %v992_v26  ;;  %v2113_v29 = vpop.f32.mrf.mxu1  ;;  %v1798_v26 = vld [vmem:[%s2562_s5 + $0x140] sm:$0xff] }
 0x208   : > { %1736 = vst [vmem:[%s2927_s13 + $0x90] sm:$0xff] %v1096_v28  ;;  %vm1066_vm5 = vcmp.eq.f32.partialorder %v2113_v29, 0.0 }
 0x209   : > { %v1099_v31 = vsel %vm1066_vm5, %v1723_v27, %v2113_v29  ;;  %v1002_v32 = vpop.f32.mrf.mxu1  ;;  %v1801_v29 = vld [vmem:[%s2562_s5 + $0x158] sm:$0xff] }
 0x20a   : > { %1739 = vst [vmem:[%s2927_s13 + $0xa8] sm:$0xff] %v1099_v31  ;;  %vm1065_vm6 = vcmp.eq.f32.partialorder %v1002_v32, 0.0 }
 0x20b   : > { %v1098_v34 = vsel %vm1065_vm6, %v1722_v30, %v1002_v32  ;;  %v2116_v35 = vpop.f32.mrf.mxu1  ;;  %v1800_v32 = vld [vmem:[%s2562_s5 + $0x150] sm:$0xff] }
 0x20c   : > { %1738 = vst [vmem:[%s2927_s13 + $0xa0] sm:$0xff] %v1098_v34  ;;  %vm1068_vm7 = vcmp.eq.f32.partialorder %v2116_v35, 0.0 }
 0x20d   : > { %v1101_v37 = vsel %vm1068_vm7, %v1725_v33, %v2116_v35  ;;  %v1012_v38 = vpop.f32.mrf.mxu1  ;;  %v1803_v35 = vld [vmem:[%s2562_s5 + $0x168] sm:$0xff] }
 0x20e   : > { %1741 = vst [vmem:[%s2927_s13 + $0xb8] sm:$0xff] %v1101_v37  ;;  %vm1067_vm8 = vcmp.eq.f32.partialorder %v1012_v38, 0.0 }
 0x20f   : > { %v1100_v40 = vsel %vm1067_vm8, %v1724_v36, %v1012_v38  ;;  %v2119_v41 = vpop.f32.mrf.mxu1  ;;  %v1802_v38 = vld [vmem:[%s2562_s5 + $0x160] sm:$0xff] }
 0x210   : > { %1740 = vst [vmem:[%s2927_s13 + $0xb0] sm:$0xff] %v1100_v40  ;;  %vm1070_vm9 = vcmp.eq.f32.partialorder %v2119_v41, 0.0 }
 0x211   : > { %v1103_v43 = vsel %vm1070_vm9, %v1727_v39, %v2119_v41  ;;  %v1022_v44 = vpop.f32.mrf.mxu1  ;;  %v1805_v41 = vld [vmem:[%s2562_s5 + $0x178] sm:$0xff] }
 0x212   : > { %1743 = vst [vmem:[%s2927_s13 + $0xc8] sm:$0xff] %v1103_v43  ;;  %vm1069_vm10 = vcmp.eq.f32.partialorder %v1022_v44, 0.0 }
 0x213   : > { %v1102_v46 = vsel %vm1069_vm10, %v1726_v42, %v1022_v44  ;;  %v2122_v47 = vpop.f32.mrf.mxu1  ;;  %v1804_v44 = vld [vmem:[%s2562_s5 + $0x170] sm:$0xff]  ;;  %s2402_s5 = smov [#allocation7]  }
 0x214   : > { %1742 = vst [vmem:[%s2927_s13 + $0xc0] sm:$0xff] %v1102_v46  ;;  %vm1072_vm11 = vcmp.eq.f32.partialorder %v2122_v47, 0.0  ;;  %s2332_s25 = sshll.u32 %s2402_s5, 4  ;;  %s2333_s25 = int_to_ptr.vmem [resolvable:$false] %s2332_s25 }
 0x215   : > { %v1105_v49 = vsel %vm1072_vm11, %v1729_v45, %v2122_v47  ;;  %v1032_v50 = vpop.f32.mrf.mxu1  ;;  %s2334_s28 = scalar_lea.vmem %s2333_s25, 12288  ;;  %p2335_p10 = scmp.lt.s32.totalorder %s3028_s26, %s2333_s25 }
 0x216   : > { %1745 = vst [vmem:[%s2927_s13 + $0xd8] sm:$0xff] %v1105_v49  ;;  %vm1071_vm12 = vcmp.eq.f32.partialorder %v1032_v50, 0.0  ;;  %p2336_p12 = scmp.lt.s32.totalorder %s2334_s28, %s2328_s6 }
 0x217   : > { %v1104_v52 = vsel %vm1071_vm12, %v1728_v48, %v1032_v50  ;;  %v2125_v53 = vpop.f32.mrf.mxu1 }
 0x218   : > { %1744 = vst [vmem:[%s2927_s13 + $0xd0] sm:$0xff] %v1104_v52  ;;  %vm1074_vm13 = vcmp.eq.f32.partialorder %v2125_v53, 0.0  ;;  %p2337_p13 = por %p2336_p12, %p2335_p10 }
 0x219   : > { %v1107_v55 = vsel %vm1074_vm13, %v1731_v51, %v2125_v53  ;;  %v1042_v56 = vpop.f32.mrf.mxu1 }
 0x21a   : > { %1747 = vst [vmem:[%s2927_s13 + $0xe8] sm:$0xff] %v1107_v55  ;;  %vm1073_vm14 = vcmp.eq.f32.partialorder %v1042_v56, 0.0  ;;  %p2338_p0 = pnand %p2337_p13, %p2331_p9 }
 0x21b   : > { %v1106_v58 = vsel %vm1073_vm14, %v1730_v54, %v1042_v56  ;;  %v2128_v59 = vpop.f32.mrf.mxu1 }
 0x21c   : > { %1746 = vst [vmem:[%s2927_s13 + $0xe0] sm:$0xff] %v1106_v58  ;;  %vm1076_vm15 = vcmp.eq.f32.partialorder %v2128_v59, 0.0 }
 0x21d   : > { %v1109_v61 = vsel %vm1076_vm15, %v1733_v57, %v2128_v59  ;;  %v1052_v62 = vpop.f32.mrf.mxu1 }
 0x21e   : > { %1749 = vst [vmem:[%s2927_s13 + $0xf8] sm:$0xff] %v1109_v61  ;;  %vm1075_vm0 = vcmp.eq.f32.partialorder %v1052_v62, 0.0 }
 0x21f   : > { %v1108_v0 = vsel %vm1075_vm0, %v1732_v60, %v1052_v62  ;;  %v2187_v1 = vpop.f32.mrf.mxu1 }
 0x220   : > { %1748 = vst [vmem:[%s2927_s13 + $0xf0] sm:$0xff] %v1108_v0  ;;  %vm1475_vm1 = vcmp.eq.f32.partialorder %v2187_v1, 0.0 }
 0x221   : > { %v1508_v3 = vsel %vm1475_vm1, %v1791_v63, %v2187_v1  ;;  %v1395_v4 = vpop.f32.mrf.mxu1 }
 0x222   : > { %1807 = vst [vmem:[%s2927_s13 + $0x108] sm:$0xff] %v1508_v3  ;;  %vm1474_vm2 = vcmp.eq.f32.partialorder %v1395_v4, 0.0 }
 0x223   : > { %v1507_v6 = vsel %vm1474_vm2, %v1790_v2, %v1395_v4  ;;  %v2190_v7 = vpop.f32.mrf.mxu1 }
 0x224   : > { %1806 = vst [vmem:[%s2927_s13 + $0x100] sm:$0xff] %v1507_v6  ;;  %vm1477_vm3 = vcmp.eq.f32.partialorder %v2190_v7, 0.0 }
 0x225   : > { %v1510_v9 = vsel %vm1477_vm3, %v1793_v5, %v2190_v7  ;;  %v1405_v10 = vpop.f32.mrf.mxu1 }
 0x226   : > { %1809 = vst [vmem:[%s2927_s13 + $0x118] sm:$0xff] %v1510_v9  ;;  %vm1476_vm4 = vcmp.eq.f32.partialorder %v1405_v10, 0.0 }
 0x227   : > { %v1509_v12 = vsel %vm1476_vm4, %v1792_v8, %v1405_v10  ;;  %v2193_v13 = vpop.f32.mrf.mxu1 }
 0x228   : > { %1808 = vst [vmem:[%s2927_s13 + $0x110] sm:$0xff] %v1509_v12  ;;  %vm1479_vm5 = vcmp.eq.f32.partialorder %v2193_v13, 0.0 }
 0x229   : > { %v1512_v15 = vsel %vm1479_vm5, %v1795_v11, %v2193_v13  ;;  %v1415_v16 = vpop.f32.mrf.mxu1 }
 0x22a   : > { %1811 = vst [vmem:[%s2927_s13 + $0x128] sm:$0xff] %v1512_v15  ;;  %vm1478_vm6 = vcmp.eq.f32.partialorder %v1415_v16, 0.0 }
 0x22b   : > { %v1511_v18 = vsel %vm1478_vm6, %v1794_v14, %v1415_v16  ;;  %v2196_v19 = vpop.f32.mrf.mxu1 }
 0x22c   : > { %1810 = vst [vmem:[%s2927_s13 + $0x120] sm:$0xff] %v1511_v18  ;;  %vm1481_vm7 = vcmp.eq.f32.partialorder %v2196_v19, 0.0 }
 0x22d   : > { %v1514_v21 = vsel %vm1481_vm7, %v1797_v17, %v2196_v19  ;;  %v1425_v22 = vpop.f32.mrf.mxu1 }
 0x22e   : > { %1813 = vst [vmem:[%s2927_s13 + $0x138] sm:$0xff] %v1514_v21  ;;  %vm1480_vm8 = vcmp.eq.f32.partialorder %v1425_v22, 0.0 }
 0x22f   : > { %v1513_v24 = vsel %vm1480_vm8, %v1796_v20, %v1425_v22  ;;  %v2199_v25 = vpop.f32.mrf.mxu1 }
 0x230   : > { %1812 = vst [vmem:[%s2927_s13 + $0x130] sm:$0xff] %v1513_v24  ;;  %vm1483_vm9 = vcmp.eq.f32.partialorder %v2199_v25, 0.0 }
 0x231   : > { %v1516_v27 = vsel %vm1483_vm9, %v1799_v23, %v2199_v25  ;;  %v1435_v28 = vpop.f32.mrf.mxu1 }
 0x232   : > { %1815 = vst [vmem:[%s2927_s13 + $0x148] sm:$0xff] %v1516_v27  ;;  %vm1482_vm10 = vcmp.eq.f32.partialorder %v1435_v28, 0.0 }
 0x233   : > { %v1515_v30 = vsel %vm1482_vm10, %v1798_v26, %v1435_v28  ;;  %v2202_v31 = vpop.f32.mrf.mxu1 }
 0x234   : > { %1814 = vst [vmem:[%s2927_s13 + $0x140] sm:$0xff] %v1515_v30  ;;  %vm1485_vm11 = vcmp.eq.f32.partialorder %v2202_v31, 0.0 }
 0x235   : > { %v1518_v33 = vsel %vm1485_vm11, %v1801_v29, %v2202_v31  ;;  %v1445_v34 = vpop.f32.mrf.mxu1 }
 0x236   : > { %1817 = vst [vmem:[%s2927_s13 + $0x158] sm:$0xff] %v1518_v33  ;;  %vm1484_vm12 = vcmp.eq.f32.partialorder %v1445_v34, 0.0 }
 0x237   : > { %v1517_v36 = vsel %vm1484_vm12, %v1800_v32, %v1445_v34  ;;  %v2205_v37 = vpop.f32.mrf.mxu1 }
 0x238   : > { %1816 = vst [vmem:[%s2927_s13 + $0x150] sm:$0xff] %v1517_v36  ;;  %vm1487_vm13 = vcmp.eq.f32.partialorder %v2205_v37, 0.0 }
 0x239   : > { %v1520_v39 = vsel %vm1487_vm13, %v1803_v35, %v2205_v37  ;;  %v1455_v40 = vpop.f32.mrf.mxu1 }
 0x23a   : > { %1819 = vst [vmem:[%s2927_s13 + $0x168] sm:$0xff] %v1520_v39  ;;  %vm1486_vm14 = vcmp.eq.f32.partialorder %v1455_v40, 0.0 }
 0x23b   : > { %v1519_v42 = vsel %vm1486_vm14, %v1802_v38, %v1455_v40  ;;  %v2208_v43 = vpop.f32.mrf.mxu1 }
 0x23c   : > { %1818 = vst [vmem:[%s2927_s13 + $0x160] sm:$0xff] %v1519_v42  ;;  %vm1489_vm15 = vcmp.eq.f32.partialorder %v2208_v43, 0.0 }
 0x23d   : > { %v1522_v45 = vsel %vm1489_vm15, %v1805_v41, %v2208_v43  ;;  %v1465_v46 = vpop.f32.mrf.mxu1 }
 0x23e   : > { %1821 = vst [vmem:[%s2927_s13 + $0x178] sm:$0xff] %v1522_v45  ;;  %vm1488_vm0 = vcmp.eq.f32.partialorder %v1465_v46, 0.0 }
 0x23f   : > { %v1521_v47 = vsel %vm1488_vm0, %v1804_v44, %v1465_v46 }
 0x240   : > { %1820 = vst [vmem:[%s2927_s13 + $0x170] sm:$0xff] %v1521_v47 }
 0x241   : > { %2341 = shalt.err (!%p2338_p0)
}
 0x242   : > { %s2342_s29 = scalar_lea.hbm %s3026_s23, 6144  ;;  %s2346_s24 = scalar_lea.hbm %s3077_s4, 12288 }
 0x243   : > { %p2343_p11 = scmp.ne.s32.totalorder %s3026_s23, %s2342_s29  ;;  %p2347_p6 = scmp.lt.s32.totalorder %s3026_s23, %s3077_s4 }
 0x244   : > { %p2348_p7 = scmp.lt.s32.totalorder %s2346_s24, %s2342_s29 }
 0x245   : > { %p2344_p2 = pnand %p2343_p11, %p3093_p3 }
 0x246   : > { %p2349_p4 = por %p2348_p7, %p2347_p6 }
 0x247   : > { %p2345_p1 = pneg %p2344_p2 }
 0x249   : > { %p2350_p8 = pnand %p2349_p4, %p2345_p1 }
 0x24b   : > { %2353 = shalt.err (!%p2350_p8)
}
 0x24c   : > { %s2403_s13 = smov 128   ;;  %s2404_s14 = smov 8  }
 0x24d   : > { %2219 = dma.vmem_to_hbm [thread:$0]  (%p3093_p3), %s3028_s26, 6144, %s3026_s23, %s1541_s19, %s2403_s13, %s2403_s13, %s2404_s14  }
 0x24e PF: > { %s1569_s7 = sand.u32 1, %s2384_s15   ;;  %p3094_p5 = scmp.ne.s32.totalorder %s3083_s22, 0 }
 0x24f   : > { %p3095_p9 = scmp.ge.s32.totalorder %s2396_s18, 2  ;;  %s1570_s8 = scalar_lea.sflag [#allocation4], %s1569_s7 }
 0x251   : > { %p2230_p10 = pnand %p3095_p9, %p3094_p5 }
 0x253   : > { %p2231_p12 = pneg %p2230_p10 }
 0x255   : > { %2379 = dma.done.wait (%p2231_p12), %s1570_s8, 6144  }
 0x256   : > { %2381 = vsyncadd (%p2231_p12), %s1570_s8, 4294961152  ;;  %p18_p13 = scmp.ge.s32.totalorder %s2484_s27, 4   ;;  %s3096_s15 = smov %s2388_s16 }
 0x257   : > { %s3097_s16 = smov %s2392_s17  ;;  %s3098_s17 = smov %s2504_s9 }
 0x258   : > { %s3099_s18 = smov %s2484_s27  ;;  %20 = sbr.rel (!%p18_p13) target bundleno = 6 (0x6), region = 92 }
 0x25d   :  { %1575 = vsyncpa [#allocation3], 1 }
 0x25e   :  { %1577 = vsyncpa [#allocation3 + $0x1], 1 }
 0x25f   :  { %1578 = vsyncpa [#allocation6], 1 }
 0x260   :  { %1580 = vsyncpa [#allocation6 + $0x1], 1 }
 0x261   :  { %1581 = vsyncpa [#allocation4], 1 }
 0x262   :  { %1583 = vsyncpa [#allocation4 + $0x1], 1 }

</bundles_post_ra>
